<compile_context>
chip_gen: v5e
topology: v5e:2x2
jax: 0.10.0
libtpu: 0.0.40
codegen_flags: <defaults>
</compile_context>

<pallas_src>
import functools

import jax
import jax.numpy as jnp
from jax.experimental import pallas as pl
from jax.experimental.pallas import tpu as pltpu


def _round_up(x, m):
    return ((x + m - 1) // m) * m


def _vmem_capacity_bytes():
    """Per-TensorCore VMEM capacity; conservative v7x default if query fails."""
    try:
        return int(pltpu.get_tpu_info().vmem_capacity_bytes)
    except Exception:
        return 64 * 1024 * 1024


# --------------------------------------------------------------------------
# Kernel bodies
# --------------------------------------------------------------------------
def _ffn_resident_kernel(x_ref, w1_ref, b1_ref, w2_ref, b2_ref, o_ref):
    """One row tile: y = relu(x @ W1 + b1) @ W2 + b2, weights VMEM-resident."""
    x = x_ref[...].astype(w1_ref.dtype)  # f32 row tile -> bf16 MXU operand
    h = jnp.dot(x, w1_ref[...], preferred_element_type=jnp.float32)
    h = jnp.maximum(h + b1_ref[...], 0.0)
    # TODO(synk): training-mode dropout (pltpu.prng_seed/prng_random_bits mask
    # + 1/(1-p) scale) not implemented; matches eval() where nn.Dropout is id.
    y = jnp.dot(h.astype(w2_ref.dtype), w2_ref[...],
                preferred_element_type=jnp.float32)
    o_ref[...] = (y + b2_ref[...]).astype(o_ref.dtype)


def _ffn_streamed_kernel(x_ref, w1_ref, b1_ref, w2_ref, b2_ref, o_ref, acc_ref):
    """Fallback: hidden dim streamed as reduction axis with f32 accumulator."""
    k = pl.program_id(1)

    @pl.when(k == 0)
    def _init():
        acc_ref[...] = jnp.zeros_like(acc_ref)

    x = x_ref[...].astype(w1_ref.dtype)
    h = jnp.dot(x, w1_ref[...], preferred_element_type=jnp.float32)
    h = jnp.maximum(h + b1_ref[...], 0.0)
    # TODO(synk): training-mode dropout not implemented (eval-mode identity).
    acc_ref[...] += jnp.dot(h.astype(w2_ref.dtype), w2_ref[...],
                            preferred_element_type=jnp.float32)

    @pl.when(k == pl.num_programs(1) - 1)
    def _finalize():
        o_ref[...] = (acc_ref[...] + b2_ref[...]).astype(o_ref.dtype)


# --------------------------------------------------------------------------
# One-time parameter prep (outside the jitted hot path)
# --------------------------------------------------------------------------
def prepare_ffn_params(w1, b1, w2, b2, *, td=512, compute_dtype=jnp.bfloat16):
    """Transpose nn.Linear weights (out,in)->(in,out) once, pad feature dims to
    lane-dense multiples of 128 (hidden dim to a multiple of the streamed-path
    tile `td`; use td=1024 on v6e if the streamed path is expected), and cast
    weights to the bf16 MXU compute dtype.  Biases stay f32 (added to the f32
    accumulator/product).  Returns (w1t, b1p, w2t, b2p, td_used)."""
    d_units, n_units = w1.shape  # linear1 weight: (out=d_units, in=n_units)
    n_pad = _round_up(n_units, 128)
    d_pad = _round_up(d_units, 128)
    td = min(td, d_pad)
    d_pad = _round_up(d_pad, td)

    w1t = (jnp.zeros((n_pad, d_pad), compute_dtype)
           .at[:n_units, :d_units].set(w1.T.astype(compute_dtype)))
    w2t = (jnp.zeros((d_pad, n_pad), compute_dtype)
           .at[:d_units, :n_units].set(w2.T.astype(compute_dtype)))
    b1p = jnp.zeros((1, d_pad), jnp.float32).at[0, :d_units].set(
        b1.astype(jnp.float32))
    b2p = jnp.zeros((1, n_pad), jnp.float32).at[0, :n_units].set(
        b2.astype(jnp.float32))
    return w1t, b1p, w2t, b2p, td


# --------------------------------------------------------------------------
# Wrapper
# --------------------------------------------------------------------------
@functools.partial(jax.jit, static_argnames=("tm", "td", "out_dtype"))
def positionwise_ffn(x, w1t, b1p, w2t, b2p, *, tm=512, td=512, out_dtype=None):
    """x: (B, T, n_units); w1t/b1p/w2t/b2p from prepare_ffn_params.

    tm: row tile (default 512; multiples of 256 recommended on v6e/v7x,
        multiples of 128 on v5e).  It is clamped to the actual row count so
        small batches don't compute dead pad rows.  Keep >= 2 row tiles of
        work on v7x so both TensorCores are used.
    td: hidden-dim tile for the streamed fallback path (must divide d_pad from
        prepare_ffn_params; use 1024 on v6e).
    out_dtype: output dtype; defaults to x.dtype (f32).  Pass jnp.bfloat16 to
        halve output writeback if the consumer tolerates it.
    """
    B, T, n_units = x.shape
    n_pad, d_pad = w1t.shape
    out_dtype = x.dtype if out_dtype is None else jnp.dtype(out_dtype)
    compute_dtype = w1t.dtype
    w_bytes_per_el = jnp.dtype(compute_dtype).itemsize

    M = B * T
    if M < tm:
        # Shrink the row tile to just cover the real rows (sublane-aligned).
        tm = _round_up(M, 8)
    M_pad = _round_up(M, tm)

    # Keep x in its native f32; cast to bf16 inside the kernel.  Pad only when
    # actually needed (no extra HBM pass for aligned shapes).
    x2d = x.reshape(M, n_units)
    if (M_pad != M) or (n_pad != n_units):
        x2d = jnp.pad(x2d, ((0, M_pad - M), (0, n_pad - n_units)))

    # ---- generation-aware VMEM budgeting / path selection ----
    vmem_cap = _vmem_capacity_bytes()
    budget = int(0.80 * vmem_cap)          # headroom for compiler scratch

    x_blk_bytes = 2 * tm * n_pad * x2d.dtype.itemsize          # double-buffered
    out_blk_bytes = 2 * tm * n_pad * jnp.dtype(out_dtype).itemsize
    h_bytes = tm * d_pad * 4                                    # f32 hidden tile
    bias_bytes = 2 * (d_pad + n_pad) * 4 * 2
    weight_bytes = 2 * n_pad * d_pad * w_bytes_per_el           # W1 + W2, 1-buffered

    resident_need = weight_bytes + x_blk_bytes + out_blk_bytes + h_bytes + bias_bytes
    use_resident = resident_need <= budget

    if use_resident:
        # ---- fused, weight-resident path: grid over row tiles only ----
        vmem_limit = min(2 * resident_need + (8 << 20), budget)
        grid = (M_pad // tm,)
        out2d = pl.pallas_call(
            _ffn_resident_kernel,
            out_shape=jax.ShapeDtypeStruct((M_pad, n_pad), out_dtype),
            grid_spec=pltpu.PrefetchScalarGridSpec(
                num_scalar_prefetch=0,
                grid=grid,
                in_specs=[
                    pl.BlockSpec((tm, n_pad), lambda i: (i, 0)),        # x rows
                    pl.BlockSpec((n_pad, d_pad), lambda i: (0, 0),      # W1 (resident)
                                 pipeline_mode=pl.Buffered(1)),
                    pl.BlockSpec((1, d_pad), lambda i: (0, 0)),         # b1
                    pl.BlockSpec((d_pad, n_pad), lambda i: (0, 0),      # W2 (resident)
                                 pipeline_mode=pl.Buffered(1)),
                    pl.BlockSpec((1, n_pad), lambda i: (0, 0)),         # b2
                ],
                out_specs=pl.BlockSpec((tm, n_pad), lambda i: (i, 0)),
            ),
            compiler_params=pltpu.CompilerParams(
                dimension_semantics=("parallel",),
                vmem_limit_bytes=int(vmem_limit),
            ),
        )(x2d, w1t, b1p, w2t, b2p)
    else:
        # ---- streamed fallback: hidden dim is a reduction grid axis ----
        td_eff = min(td, d_pad)
        if d_pad % td_eff != 0:
            td_eff = d_pad
        streamed_need = (x_blk_bytes + out_blk_bytes
                         + 2 * 2 * n_pad * td_eff * w_bytes_per_el   # W1+W2 tiles, 2-buf
                         + tm * n_pad * 4                             # acc scratch
                         + tm * td_eff * 4 + bias_bytes)
        vmem_limit = min(2 * streamed_need + (8 << 20), budget)
        grid = (M_pad // tm, d_pad // td_eff)
        out2d = pl.pallas_call(
            _ffn_streamed_kernel,
            out_shape=jax.ShapeDtypeStruct((M_pad, n_pad), out_dtype),
            grid_spec=pltpu.PrefetchScalarGridSpec(
                num_scalar_prefetch=0,
                grid=grid,
                in_specs=[
                    pl.BlockSpec((tm, n_pad), lambda i, k: (i, 0)),     # x rows
                    pl.BlockSpec((n_pad, td_eff), lambda i, k: (0, k)),  # W1 k-slice
                    pl.BlockSpec((1, td_eff), lambda i, k: (0, k)),      # b1 k-slice
                    pl.BlockSpec((td_eff, n_pad), lambda i, k: (k, 0)),  # W2 k-slice
                    pl.BlockSpec((1, n_pad), lambda i, k: (0, 0)),       # b2
                ],
                out_specs=pl.BlockSpec((tm, n_pad), lambda i, k: (i, 0)),
                scratch_shapes=[pltpu.VMEM((tm, n_pad), jnp.float32)],
            ),
            compiler_params=pltpu.CompilerParams(
                dimension_semantics=("parallel", "arbitrary"),
                vmem_limit_bytes=int(vmem_limit),
            ),
        )(x2d, w1t, b1p, w2t, b2p)

    return out2d[:M, :n_units].reshape(B, T, n_units)


if __name__ == "__main__":
    # Module hyperparameters (small, consistent with the forward pass).
    B, T = 2, 8          # batch, sequence length
    n_units = 32         # model width
    d_units = 64         # hidden width
    # dropout p is irrelevant in eval mode (identity).

    key = jax.random.PRNGKey(0)
    kx, kw1, kb1, kw2, kb2 = jax.random.split(key, 5)

    x = jax.random.normal(kx, (B, T, n_units), dtype=jnp.float32)
    # Deterministic synthetic parameters (nn.Linear shapes: (out, in) / (out,)).
    w1 = jax.random.normal(kw1, (d_units, n_units), dtype=jnp.float32) * 0.1
    b1 = jax.random.normal(kb1, (d_units,), dtype=jnp.float32) * 0.1
    w2 = jax.random.normal(kw2, (n_units, d_units), dtype=jnp.float32) * 0.1
    b2 = jax.random.normal(kb2, (n_units,), dtype=jnp.float32) * 0.1

    # One-time parameter prep (transpose / pad / bf16 cast), outside the jit.
    w1t, b1p, w2t, b2p, td = prepare_ffn_params(w1, b1, w2, b2, td=512)

    out = positionwise_ffn(x, w1t, b1p, w2t, b2p, tm=512, td=td)
    out = jax.block_until_ready(out)

    # Pure-JAX f32 reference check of the fused kernel.
    # Note: MXU operands (x tile, W1, W2, relu output) are bf16 with f32
    # accumulation, so tolerance is looser than a pure-f32 comparison.
    h_ref = jnp.maximum(x @ w1.T + b1, 0.0)
    y_ref = h_ref @ w2.T + b2
    assert out.shape == (B, T, n_units)
    err = float(jnp.max(jnp.abs(out - y_ref)))
    assert jnp.allclose(out, y_ref, atol=5e-2, rtol=5e-2), f"max abs err {err}"

    print("KERNEL_OK")
</pallas_src>

<mosaic_0001>
module attributes {stable_mosaic.version = 11 : i64} {
  func.func @_ffn_resident_kernel(%arg0: i32, %arg1: memref<16x128xf32, #tpu.memory_space<vmem>>, %arg2: memref<128x128xbf16, #tpu.memory_space<vmem>>, %arg3: memref<1x128xf32, #tpu.memory_space<vmem>>, %arg4: memref<128x128xbf16, #tpu.memory_space<vmem>>, %arg5: memref<1x128xf32, #tpu.memory_space<vmem>>, %arg6: memref<16x128xf32, #tpu.memory_space<vmem>>) attributes {dimension_semantics = [#tpu.dimension_semantics<parallel>], iteration_bounds = array<i64: 1>, scalar_prefetch = 0 : i64, scratch_operands = 0 : i64, tpu.core_type = #tpu.core_type<tc>, window_params = [{transform_indices = @transform_0, window_bounds = array<i64: 16, 128>}, {pipeline_mode = #tpu.pipeline_mode<synchronous>, transform_indices = @transform_1, window_bounds = array<i64: 128, 128>}, {pipeline_mode = #tpu.pipeline_mode<synchronous>, transform_indices = @transform_2, window_bounds = array<i64: 1, 128>}, {pipeline_mode = #tpu.pipeline_mode<synchronous>, transform_indices = @transform_3, window_bounds = array<i64: 128, 128>}, {pipeline_mode = #tpu.pipeline_mode<synchronous>, transform_indices = @transform_4, window_bounds = array<i64: 1, 128>}, {transform_indices = @transform_5, window_bounds = array<i64: 16, 128>}]} {
    %c0 = arith.constant 0 : index
    %c0_0 = arith.constant 0 : index
    %0 = vector.load %arg1[%c0, %c0_0] : memref<16x128xf32, #tpu.memory_space<vmem>>, vector<16x128xf32>
    %1 = arith.truncf %0 : vector<16x128xf32> to vector<16x128xbf16>
    %c0_1 = arith.constant 0 : index
    %c0_2 = arith.constant 0 : index
    %2 = vector.load %arg2[%c0_1, %c0_2] : memref<128x128xbf16, #tpu.memory_space<vmem>>, vector<128x128xbf16>
    %cst = arith.constant dense<0.000000e+00> : vector<16x128xf32>
    %3 = tpu.matmul %1, %2, %cst {dimension_numbers = #tpu.dot_dimension_numbers<[1], [0], [0], [1], [0, 0, 1, 1], [], []>} : vector<16x128xbf16>, vector<128x128xbf16>, vector<16x128xf32> -> vector<16x128xf32>
    %c0_3 = arith.constant 0 : index
    %c0_4 = arith.constant 0 : index
    %4 = vector.load %arg3[%c0_3, %c0_4] : memref<1x128xf32, #tpu.memory_space<vmem>>, vector<1x128xf32>
    %5 = vector.broadcast %4 : vector<1x128xf32> to vector<16x128xf32>
    %6 = arith.addf %3, %5 : vector<16x128xf32>
    %cst_5 = arith.constant 0.000000e+00 : f32
    %7 = vector.broadcast %cst_5 : f32 to vector<16x128xf32>
    %8 = arith.maximumf %6, %7 : vector<16x128xf32>
    %9 = arith.truncf %8 : vector<16x128xf32> to vector<16x128xbf16>
    %c0_6 = arith.constant 0 : index
    %c0_7 = arith.constant 0 : index
    %10 = vector.load %arg4[%c0_6, %c0_7] : memref<128x128xbf16, #tpu.memory_space<vmem>>, vector<128x128xbf16>
    %cst_8 = arith.constant dense<0.000000e+00> : vector<16x128xf32>
    %11 = tpu.matmul %9, %10, %cst_8 {dimension_numbers = #tpu.dot_dimension_numbers<[1], [0], [0], [1], [0, 0, 1, 1], [], []>} : vector<16x128xbf16>, vector<128x128xbf16>, vector<16x128xf32> -> vector<16x128xf32>
    %c0_9 = arith.constant 0 : index
    %c0_10 = arith.constant 0 : index
    %12 = vector.load %arg5[%c0_9, %c0_10] : memref<1x128xf32, #tpu.memory_space<vmem>>, vector<1x128xf32>
    %13 = vector.broadcast %12 : vector<1x128xf32> to vector<16x128xf32>
    %14 = arith.addf %11, %13 : vector<16x128xf32>
    %c0_11 = arith.constant 0 : index
    %c0_12 = arith.constant 0 : index
    %15 = vector.load %arg6[%c0_11, %c0_12] : memref<16x128xf32, #tpu.memory_space<vmem>>, vector<16x128xf32>
    tpu.vector_store %arg6[%c0_11, %c0_12], %14 {strides = array<i32>} : memref<16x128xf32, #tpu.memory_space<vmem>>, vector<16x128xf32>,
    return
  }
  func.func @transform_0(%arg0: i32) -> (i32, i32) {
    %c0_i32 = arith.constant 0 : i32
    %c0_i32_0 = arith.constant 0 : i32
    return %arg0, %c0_i32 : i32, i32
  }
  func.func @transform_1(%arg0: i32) -> (i32, i32) {
    %c0_i32 = arith.constant 0 : i32
    %c0_i32_0 = arith.constant 0 : i32
    %c0_i32_1 = arith.constant 0 : i32
    return %c0_i32, %c0_i32_0 : i32, i32
  }
  func.func @transform_2(%arg0: i32) -> (i32, i32) {
    %c0_i32 = arith.constant 0 : i32
    %c0_i32_0 = arith.constant 0 : i32
    %c0_i32_1 = arith.constant 0 : i32
    return %c0_i32, %c0_i32_0 : i32, i32
  }
  func.func @transform_3(%arg0: i32) -> (i32, i32) {
    %c0_i32 = arith.constant 0 : i32
    %c0_i32_0 = arith.constant 0 : i32
    %c0_i32_1 = arith.constant 0 : i32
    return %c0_i32, %c0_i32_0 : i32, i32
  }
  func.func @transform_4(%arg0: i32) -> (i32, i32) {
    %c0_i32 = arith.constant 0 : i32
    %c0_i32_0 = arith.constant 0 : i32
    %c0_i32_1 = arith.constant 0 : i32
    return %c0_i32, %c0_i32_0 : i32, i32
  }
  func.func @transform_5(%arg0: i32) -> (i32, i32) {
    %c0_i32 = arith.constant 0 : i32
    %c0_i32_0 = arith.constant 0 : i32
    return %arg0, %c0_i32 : i32, i32
  }
}

</mosaic_0001>

<bundles_post_ra>
// kernel: positionwise_ffn.1
= control target key start
LH: loop header
LB: loop body
LE: loop exit
PB: predicated region body
PF: predicated region fallthrough
CT: control target
= control target key end

     0   :  { %10 = vsyncpa [#allocation3], 0  ;;  %s426_s0 = inlined_call_operand.vmem [shape: f32[16,128], index: 0, kind: input, shape index: {}]   ;;  %s427_s1 = inlined_call_operand.hbm [shape: bf16[128,128], index: 1, kind: input, shape index: {}]   ;;  %s428_s2 = inlined_call_operand.vmem [shape: f32[1,128], index: 2, kind: input, shape index: {}]   ;;  %s429_s3 = inlined_call_operand.hbm [shape: bf16[128,128], index: 3, kind: input, shape index: {}]   ;;  %s430_s4 = inlined_call_operand.vmem [shape: f32[1,128], index: 4, kind: input, shape index: {}]   ;;  %s431_s5 = inlined_call_operand.vmem [shape: f32[16,128], index: 5, kind: output, shape index: {}]  }
   0x1   :  { %s18_s20 = sshll.u32 %s427_s1, 4  ;;  %s19_s20 = int_to_ptr.hbm [resolvable:$true] %s18_s20 }
   0x2   :  { %11 = vsyncpa [#allocation5], 0  ;;  %s368_s21 = smov [#allocation2]   ;;  %s33_s25 = sshll.u32 %s429_s3, 4  ;;  %s34_s25 = int_to_ptr.hbm [resolvable:$true] %s33_s25 }
   0x3   :  { %s20_s22 = sshll.u32 %s368_s21, 4  ;;  %s369_s26 = smov 64   ;;  %s21_s22 = int_to_ptr.vmem [resolvable:$true] %s20_s22 }
   0x4   :  { %s370_s27 = smov 4   ;;  %s371_s28 = smov [#allocation4]  }
   0x5   :  { %26 = dma.hbm_to_vmem [thread:$0]  %s19_s20, 1024, %s21_s22, [#allocation3], %s369_s26, %s369_s26, %s370_s27  }
   0x6   :  { %s35_s29 = sshll.u32 %s371_s28, 4  ;;  %s36_s29 = int_to_ptr.vmem [resolvable:$true] %s35_s29 }
   0x7   :  { %41 = dma.hbm_to_vmem [thread:$0]  %s34_s25, 1024, %s36_s29, [#allocation5], %s369_s26, %s369_s26, %s370_s27  }
   0x8   :  { %364 = dma.done.wait [#allocation3], 1024  }
   0x9   :  { %365 = vsyncadd [#allocation3], 4294966272 }
   0xa   :  { %366 = dma.done.wait [#allocation5], 1024  }
   0xb   :  { %367 = vsyncadd [#allocation5], 4294966272  ;;  %v301_v0 = vld [vmem:[#allocation2 + $0x38] sm:$0xff]  ;;  %v300_v1 = vld [vmem:[#allocation2 + $0x30] sm:$0xff] }
   0xc   :  { %123 = vmatpush.bf16.msra.mxu0 %v301_v0  ;;  %v309_v2 = vld [vmem:[#allocation4 + $0x38] sm:$0xff]  ;;  %v308_v3 = vld [vmem:[#allocation4 + $0x30] sm:$0xff]  ;;  %v299_v4 = vld [vmem:[#allocation2 + $0x28] sm:$0xff] }
   0xd   :  { %208 = vmatpush.bf16.msra.mxu1 %v309_v2  ;;  %v307_v5 = vld [vmem:[#allocation4 + $0x28] sm:$0xff]  ;;  %v298_v6 = vld [vmem:[#allocation2 + $0x20] sm:$0xff]  ;;  %v297_v8 = vld [vmem:[#allocation2 + $0x18] sm:$0xff] }
   0xe   :  { %v306_v7 = vld [vmem:[#allocation4 + $0x20] sm:$0xff]  ;;  %v296_v9 = vld [vmem:[#allocation2 + $0x10] sm:$0xff]  ;;  %v295_v10 = vld [vmem:[#allocation2 + $0x8] sm:$0xff] }
   0xf   :  { %v294_v11 = vld [vmem:[#allocation2] sm:$0xff]  ;;  %v53_v13 = vld [vmem:[%s426_s0 + $0x8] sm:$0xff]  ;;  %v305_v15 = vld [vmem:[#allocation4 + $0x18] sm:$0xff] }
  0x10   :  { %124 = vmatpush.bf16.msra.mxu0 %v300_v1  ;;  %v52_v12 = vld [vmem:[%s426_s0] sm:$0xff]  ;;  %v304_v16 = vld [vmem:[#allocation4 + $0x10] sm:$0xff]  ;;  %v303_v17 = vld [vmem:[#allocation4 + $0x8] sm:$0xff] }
  0x11   :  { %209 = vmatpush.bf16.msra.mxu1 %v308_v3  ;;  %v54_v14 = vpack.c.bf16 %v53_v13, %v52_v12  ;;  %v302_v18 = vld [vmem:[#allocation4] sm:$0xff] }
  0x12   :  { %v314_v20 = vld [vmem:[%s428_s2] ss:$0 sm:$0xff] }
  0x13   :  { %v315_v27 = vld [vmem:[%s430_s4] ss:$0 sm:$0xff] }
  0x14   :  { %125 = vmatpush.bf16.msra.mxu0 %v299_v4 }
  0x15   :  { %210 = vmatpush.bf16.msra.mxu1 %v307_v5 }
  0x18   :  { %126 = vmatpush.bf16.msra.mxu0 %v298_v6 }
  0x19   :  { %211 = vmatpush.bf16.msra.mxu1 %v306_v7 }
  0x1c   :  { %127 = vmatpush.bf16.msra.mxu0 %v297_v8 }
  0x1d   :  { %212 = vmatpush.bf16.msra.mxu1 %v305_v15 }
  0x20   :  { %128 = vmatpush.bf16.msra.mxu0 %v296_v9 }
  0x21   :  { %213 = vmatpush.bf16.msra.mxu1 %v304_v16 }
  0x24   :  { %129 = vmatpush.bf16.msra.mxu0 %v295_v10 }
  0x25   :  { %214 = vmatpush.bf16.msra.mxu1 %v303_v17 }
  0x28   :  { %130 = vmatpush.bf16.msra.mxu0 %v294_v11 }
  0x29   :  { %215 = vmatpush.bf16.msra.mxu1 %v302_v18 }
  0x2b   :  { %131 = vmatmul.bf16.vlgmr.msra.gmra.mxu0 %v54_v14 }
  0xa8   :  { %v132_v19 = vpop.f32.mrf.mxu0 }
  0xa9   :  { %v133_v21 = vadd.f32 %v314_v20, %v132_v19 }
  0xab   :  { %v137_v24 = vmax.f32 %v133_v21, 0.0 }
  0xb0   :  { %v134_v22 = vpop.f32.mrf.mxu0 }
  0xb1   :  { %v135_v23 = vadd.f32 %v314_v20, %v134_v22 }
  0xb3   :  { %v138_v25 = vmax.f32 %v135_v23, 0.0 }
  0xb5   :  { %v139_v26 = vpack.c.bf16 %v138_v25, %v137_v24 }
  0xb7   :  { %216 = vmatmul.bf16.vlgmr.msra.gmra.mxu1 %v139_v26 }
 0x134   :  { %v217_v28 = vpop.f32.mrf.mxu1 }
 0x135   :  { %v218_v29 = vadd.f32 %v315_v27, %v217_v28 }
 0x137   :  { %222 = vst [vmem:[%s431_s5] sm:$0xff] %v218_v29 }
 0x13c   :  { %v219_v30 = vpop.f32.mrf.mxu1 }
 0x13d   :  { %v220_v31 = vadd.f32 %v315_v27, %v219_v30 }
 0x13f   :  { %223 = vst [vmem:[%s431_s5 + $0x8] sm:$0xff] %v220_v31 }
 0x140   :  { %228 = vsyncpa [#allocation3], 1 }
 0x141   :  { %229 = vsyncpa [#allocation5], 1 }

</bundles_post_ra>
